<compile_context>
chip_gen: v7x
topology: tpu7x:2x2x1
jax: 0.10.0
libtpu: 0.0.40
codegen_flags: <defaults>
</compile_context>

<pallas_src>
import functools

import jax
import jax.numpy as jnp
from jax.experimental import pallas as pl
from jax.experimental.pallas import tpu as pltpu


def _round_up(a, b):
    return (a + b - 1) // b * b


# --------------------------------------------------------------------------
# Fused kernel: encoder patch-embed + mask-token + decoder 1x1 conv + masked
# L1 loss reduction.  Grid iterates over token tiles; loss numerator /
# denominator accumulate in VMEM scratch; final scalar written on last step.
# --------------------------------------------------------------------------
def _simmim_fused_kernel(patch_ref, mask_ref, w_pe_ref, b_pe_ref, mtok_ref,
                         w_dec_ref, b_dec_ref, loss_ref,
                         acc_num_ref, acc_den_ref,
                         *, pixels_per_patch, in_chans):
    step = pl.program_id(0)

    @pl.when(step == 0)
    def _init():
        acc_num_ref[...] = jnp.zeros_like(acc_num_ref)
        acc_den_ref[...] = jnp.zeros_like(acc_den_ref)

    px = patch_ref[...]                     # (tm, Dp) f32 patch pixels (loss target)
    m = mask_ref[...]                       # (tm, 1)  f32 per-token mask

    # Encoder: patch-embed conv == matmul.  bf16 operands on the MXU, f32 acc.
    z = jnp.dot(px.astype(jnp.bfloat16), w_pe_ref[...],
                preferred_element_type=jnp.float32) + b_pe_ref[...]    # (tm, F)
    # SimMIM masking in f32 on the VPU: z = z*(1-m) + mask_token*m.
    z = z + m * (mtok_ref[...] - z)
    # Decoder 1x1 conv == matmul.
    y = jnp.dot(z.astype(jnp.bfloat16), w_dec_ref[...],
                preferred_element_type=jnp.float32) + b_dec_ref[...]   # (tm, Cout)

    # Masked L1 partial sums.  Cout == Dp because encoder_stride == patch_size;
    # padded tail tokens carry m == 0 so they contribute nothing.
    masked_abs = jnp.abs(px - y) * m                                   # (tm, Cout)
    acc_num_ref[...] += jnp.sum(masked_abs, axis=0, keepdims=True)     # (1, Cout)
    acc_den_ref[...] += jnp.sum(m, axis=0, keepdims=True)              # (1, 1)

    @pl.when(step == pl.num_programs(0) - 1)
    def _finalize():
        num = jnp.sum(acc_num_ref[...], axis=1, keepdims=True)         # (1, 1)
        den = acc_den_ref[...] * float(pixels_per_patch) + 1e-5        # (1, 1)
        loss = num / den / float(in_chans)
        loss_ref[...] = jnp.broadcast_to(loss, (1, 128))


def simmim_fused(patches, mask_flat, w_pe, b_pe, mask_token, w_dec, b_dec,
                 *, patch_size, in_chans, tm_target=512):
    N, Dp = patches.shape
    F = w_pe.shape[1]
    Cout = w_dec.shape[1]
    # Loss fusion requires the decoder output per token to match the input
    # patch pixel layout (encoder_stride == patch_size, 3 channels).
    assert Cout == Dp, "fused loss needs encoder_stride == patch_size, C == 3"

    # Large token tiles (multiple of 128 when N allows) amortize per-grid-step
    # overhead and fill the MXU; pad N with zero-mask tokens (they contribute
    # exactly 0 to both numerator and denominator).
    tm = tm_target if N >= tm_target else _round_up(N, 8)
    N_pad = _round_up(N, tm)
    if N_pad != N:
        patches = jnp.pad(patches, ((0, N_pad - N), (0, 0)))
        mask_flat = jnp.pad(mask_flat, ((0, N_pad - N), (0, 0)))

    flops = 2 * N_pad * Dp * F + 2 * N_pad * F * Cout + 8 * N_pad * Cout
    bytes_accessed = (N_pad * (Dp + 1) * 4 + Dp * F * 2 + F * Cout * 2
                      + 2 * F * 4 + Cout * 4 + 128 * 4)

    out = pl.pallas_call(
        functools.partial(_simmim_fused_kernel,
                          pixels_per_patch=patch_size * patch_size,
                          in_chans=in_chans),
        out_shape=jax.ShapeDtypeStruct((1, 128), jnp.float32),
        grid_spec=pltpu.PrefetchScalarGridSpec(
            num_scalar_prefetch=0,
            grid=(N_pad // tm,),
            in_specs=[
                pl.BlockSpec((tm, Dp), lambda i: (i, 0)),    # patch tokens
                pl.BlockSpec((tm, 1), lambda i: (i, 0)),     # per-token mask
                pl.BlockSpec((Dp, F), lambda i: (0, 0)),     # patch-embed W (bf16)
                pl.BlockSpec((1, F), lambda i: (0, 0)),      # patch-embed b (f32)
                pl.BlockSpec((1, F), lambda i: (0, 0)),      # mask token    (f32)
                pl.BlockSpec((F, Cout), lambda i: (0, 0)),   # decoder W     (bf16)
                pl.BlockSpec((1, Cout), lambda i: (0, 0)),   # decoder b     (f32)
            ],
            out_specs=pl.BlockSpec((1, 128), lambda i: (0, 0)),
            scratch_shapes=[
                pltpu.VMEM((1, Cout), jnp.float32),          # loss numerator acc
                pltpu.VMEM((1, 1), jnp.float32),             # mask-sum acc
            ],
        ),
        compiler_params=pltpu.CompilerParams(
            dimension_semantics=("arbitrary",),              # accumulator axis
            vmem_limit_bytes=32 * 1024 * 1024,
        ),
        cost_estimate=pl.CostEstimate(flops=flops, transcendentals=0,
                                      bytes_accessed=bytes_accessed),
    )(patches, mask_flat,
      w_pe.astype(jnp.bfloat16), b_pe.astype(jnp.float32),
      mask_token.astype(jnp.float32),
      w_dec.astype(jnp.bfloat16), b_dec.astype(jnp.float32))
    return out[0, 0]


# --------------------------------------------------------------------------
# Full SimMIM forward.  Glue reshapes (im2col) stay in the same jit so XLA
# fuses them; everything else runs in the single Pallas kernel.
# --------------------------------------------------------------------------
@functools.partial(jax.jit,
                   static_argnames=("patch_size", "encoder_stride", "in_chans"))
def simmim_forward(x, mask, params, *, patch_size, encoder_stride, in_chans):
    B, C, H, W = x.shape
    P = patch_size
    assert C == 3 and in_chans == 3, "SimMIM decoder reconstructs 3 channels"
    assert encoder_stride == P, "fused loss path requires encoder_stride == patch_size"
    # TODO(synk): encoder_stride != patch_size would need an unfused decoder +
    # separate tiled loss kernel (not exercised by this module configuration).
    ph, pw = H // P, W // P
    N = B * ph * pw

    # im2col for the stride-P patch-embed conv (fused by XLA under this jit).
    # TODO(synk): im2col could be folded into the kernel via a BlockSpec over x,
    # but the in-kernel (C,P,pw,P)->(pw,C*P*P) shuffle crosses lane tiles.
    patches = (x.reshape(B, C, ph, P, pw, P)
                .transpose(0, 2, 4, 1, 3, 5)
                .reshape(N, C * P * P)).astype(jnp.float32)
    mask_flat = mask.reshape(N, 1).astype(jnp.float32)

    return simmim_fused(patches, mask_flat,
                        params["w_pe"], params["b_pe"], params["mask_token"],
                        params["w_dec"], params["b_dec"],
                        patch_size=P, in_chans=in_chans)


# --------------------------------------------------------------------------
# Pure-JAX f32 reference (mirrors the PyTorch module exactly).
# --------------------------------------------------------------------------
def simmim_forward_ref(x, mask, params, *, patch_size, encoder_stride, in_chans):
    B, C, H, W = x.shape
    P, r = patch_size, encoder_stride
    ph, pw = H // P, W // P
    N = B * ph * pw
    patches = (x.reshape(B, C, ph, P, pw, P)
                .transpose(0, 2, 4, 1, 3, 5)
                .reshape(N, C * P * P)).astype(jnp.float32)
    z = patches @ params["w_pe"] + params["b_pe"]
    m = mask.reshape(N, 1).astype(jnp.float32)
    z = z * (1.0 - m) + params["mask_token"] * m
    y = z @ params["w_dec"] + params["b_dec"]
    x_rec = (y.reshape(B, ph, pw, 3, r, r)
              .transpose(0, 3, 1, 4, 2, 5)
              .reshape(B, 3, ph * r, pw * r))
    mask_up = jnp.repeat(jnp.repeat(mask.astype(jnp.float32), P, 1), P, 2)
    mask_up = mask_up[:, None, :, :]
    loss_recon = jnp.abs(x.astype(jnp.float32) - x_rec)
    return (loss_recon * mask_up).sum() / (mask_up.sum() + 1e-5) / in_chans


if __name__ == "__main__":
    # Small, deterministic configuration (forward implies 3 input channels).
    B, in_chans, H, W = 2, 3, 16, 16
    patch_size = 4
    encoder_stride = 4
    num_features = 32
    ph, pw = H // patch_size, W // patch_size
    Dp = in_chans * patch_size * patch_size
    Cout = encoder_stride ** 2 * 3

    key = jax.random.PRNGKey(0)
    k_x, k_m, k1, k2, k3, k4, k5 = jax.random.split(key, 7)

    x = jax.random.normal(k_x, (B, in_chans, H, W), dtype=jnp.float32)
    mask = (jax.random.uniform(k_m, (B, ph, pw)) > 0.5).astype(jnp.float32)

    params = {
        "w_pe": 0.05 * jax.random.normal(k1, (Dp, num_features), jnp.float32),
        "b_pe": 0.01 * jax.random.normal(k2, (1, num_features), jnp.float32),
        "mask_token": 0.02 * jax.random.normal(k3, (1, num_features), jnp.float32),
        "w_dec": 0.05 * jax.random.normal(k4, (num_features, Cout), jnp.float32),
        "b_dec": 0.01 * jax.random.normal(k5, (1, Cout), jnp.float32),
    }

    loss = simmim_forward(x, mask, params,
                          patch_size=patch_size,
                          encoder_stride=encoder_stride,
                          in_chans=in_chans)
    loss = jax.block_until_ready(loss)

    loss_ref = simmim_forward_ref(x, mask, params,
                                  patch_size=patch_size,
                                  encoder_stride=encoder_stride,
                                  in_chans=in_chans)
    # Tolerance accommodates bf16 MXU operands (f32 accumulation).
    assert jnp.allclose(loss, loss_ref, rtol=1e-2, atol=1e-4), (loss, loss_ref)

    print("KERNEL_OK")
</pallas_src>

<mosaic_0001>
module attributes {stable_mosaic.version = 11 : i64} {
  func.func @_simmim_fused_kernel(%arg0: i32, %arg1: memref<32x48xf32, #tpu.memory_space<vmem>>, %arg2: memref<32x1xf32, #tpu.memory_space<vmem>>, %arg3: memref<48x32xbf16, #tpu.memory_space<vmem>>, %arg4: memref<1x32xf32, #tpu.memory_space<vmem>>, %arg5: memref<1x32xf32, #tpu.memory_space<vmem>>, %arg6: memref<32x48xbf16, #tpu.memory_space<vmem>>, %arg7: memref<1x48xf32, #tpu.memory_space<vmem>>, %arg8: memref<1x128xf32, #tpu.memory_space<vmem>>, %arg9: memref<1x48xf32, #tpu.memory_space<vmem>>, %arg10: memref<1x1xf32, #tpu.memory_space<vmem>>) attributes {dimension_semantics = [#tpu.dimension_semantics<arbitrary>], iteration_bounds = array<i64: 1>, scalar_prefetch = 0 : i64, scratch_operands = 2 : i64, tpu.core_type = #tpu.core_type<tc>, window_params = [{transform_indices = @transform_0, window_bounds = array<i64: 32, 48>}, {transform_indices = @transform_1, window_bounds = array<i64: 32, 1>}, {pipeline_mode = #tpu.pipeline_mode<synchronous>, transform_indices = @transform_2, window_bounds = array<i64: 48, 32>}, {pipeline_mode = #tpu.pipeline_mode<synchronous>, transform_indices = @transform_3, window_bounds = array<i64: 1, 32>}, {pipeline_mode = #tpu.pipeline_mode<synchronous>, transform_indices = @transform_4, window_bounds = array<i64: 1, 32>}, {pipeline_mode = #tpu.pipeline_mode<synchronous>, transform_indices = @transform_5, window_bounds = array<i64: 32, 48>}, {pipeline_mode = #tpu.pipeline_mode<synchronous>, transform_indices = @transform_6, window_bounds = array<i64: 1, 48>}, {pipeline_mode = #tpu.pipeline_mode<synchronous>, transform_indices = @transform_7, window_bounds = array<i64: 1, 128>}]} {
    %c0_i32 = arith.constant 0 : i32
    %0 = arith.cmpi eq, %arg0, %c0_i32 : i32
    %1 = arith.extui %0 : i1 to i32
    %c0_i32_0 = arith.constant 0 : i32
    %2 = arith.cmpi ne, %1, %c0_i32_0 : i32
    scf.if %2 {
      %cst_27 = arith.constant 0.000000e+00 : f32
      %40 = vector.broadcast %cst_27 : f32 to vector<1x48xf32>
      %c0_28 = arith.constant 0 : index
      %c0_29 = arith.constant 0 : index
      %41 = vector.load %arg9[%c0_28, %c0_29] : memref<1x48xf32, #tpu.memory_space<vmem>>, vector<1x48xf32>
      tpu.vector_store %arg9[%c0_28, %c0_29], %40 {strides = array<i32>} : memref<1x48xf32, #tpu.memory_space<vmem>>, vector<1x48xf32>,
      %cst_30 = arith.constant 0.000000e+00 : f32
      %42 = vector.broadcast %cst_30 : f32 to vector<1x1xf32>
      %c0_31 = arith.constant 0 : index
      %c0_32 = arith.constant 0 : index
      %43 = vector.load %arg10[%c0_31, %c0_32] : memref<1x1xf32, #tpu.memory_space<vmem>>, vector<1x1xf32>
      tpu.vector_store %arg10[%c0_31, %c0_32], %42 {strides = array<i32>} : memref<1x1xf32, #tpu.memory_space<vmem>>, vector<1x1xf32>,
    } else {
    }
    %c0 = arith.constant 0 : index
    %c0_1 = arith.constant 0 : index
    %3 = vector.load %arg1[%c0, %c0_1] : memref<32x48xf32, #tpu.memory_space<vmem>>, vector<32x48xf32>
    %c0_2 = arith.constant 0 : index
    %c0_3 = arith.constant 0 : index
    %4 = vector.load %arg2[%c0_2, %c0_3] : memref<32x1xf32, #tpu.memory_space<vmem>>, vector<32x1xf32>
    %5 = arith.truncf %3 : vector<32x48xf32> to vector<32x48xbf16>
    %c0_4 = arith.constant 0 : index
    %c0_5 = arith.constant 0 : index
    %6 = vector.load %arg3[%c0_4, %c0_5] : memref<48x32xbf16, #tpu.memory_space<vmem>>, vector<48x32xbf16>
    %cst = arith.constant dense<0.000000e+00> : vector<32x32xf32>
    %7 = tpu.matmul %5, %6, %cst {dimension_numbers = #tpu.dot_dimension_numbers<[1], [0], [0], [1], [0, 0, 1, 1], [], []>} : vector<32x48xbf16>, vector<48x32xbf16>, vector<32x32xf32> -> vector<32x32xf32>
    %c0_6 = arith.constant 0 : index
    %c0_7 = arith.constant 0 : index
    %8 = vector.load %arg4[%c0_6, %c0_7] : memref<1x32xf32, #tpu.memory_space<vmem>>, vector<1x32xf32>
    %9 = vector.broadcast %8 : vector<1x32xf32> to vector<32x32xf32>
    %10 = arith.addf %7, %9 : vector<32x32xf32>
    %c0_8 = arith.constant 0 : index
    %c0_9 = arith.constant 0 : index
    %11 = vector.load %arg5[%c0_8, %c0_9] : memref<1x32xf32, #tpu.memory_space<vmem>>, vector<1x32xf32>
    %12 = vector.broadcast %11 : vector<1x32xf32> to vector<32x32xf32>
    %13 = arith.subf %12, %10 : vector<32x32xf32>
    %14 = vector.broadcast %4 : vector<32x1xf32> to vector<32x32xf32>
    %15 = arith.mulf %14, %13 : vector<32x32xf32>
    %16 = arith.addf %10, %15 : vector<32x32xf32>
    %17 = arith.truncf %16 : vector<32x32xf32> to vector<32x32xbf16>
    %c0_10 = arith.constant 0 : index
    %c0_11 = arith.constant 0 : index
    %18 = vector.load %arg6[%c0_10, %c0_11] : memref<32x48xbf16, #tpu.memory_space<vmem>>, vector<32x48xbf16>
    %cst_12 = arith.constant dense<0.000000e+00> : vector<32x48xf32>
    %19 = tpu.matmul %17, %18, %cst_12 {dimension_numbers = #tpu.dot_dimension_numbers<[1], [0], [0], [1], [0, 0, 1, 1], [], []>} : vector<32x32xbf16>, vector<32x48xbf16>, vector<32x48xf32> -> vector<32x48xf32>
    %c0_13 = arith.constant 0 : index
    %c0_14 = arith.constant 0 : index
    %20 = vector.load %arg7[%c0_13, %c0_14] : memref<1x48xf32, #tpu.memory_space<vmem>>, vector<1x48xf32>
    %21 = vector.broadcast %20 : vector<1x48xf32> to vector<32x48xf32>
    %22 = arith.addf %19, %21 : vector<32x48xf32>
    %23 = arith.subf %3, %22 : vector<32x48xf32>
    %24 = math.absf %23 : vector<32x48xf32>
    %25 = vector.broadcast %4 : vector<32x1xf32> to vector<32x48xf32>
    %26 = arith.mulf %24, %25 : vector<32x48xf32>
    %c0_15 = arith.constant 0 : index
    %c0_16 = arith.constant 0 : index
    %27 = vector.load %arg9[%c0_15, %c0_16] : memref<1x48xf32, #tpu.memory_space<vmem>>, vector<1x48xf32>
    %cst_17 = arith.constant dense<0.000000e+00> : vector<48xf32>
    %28 = vector.multi_reduction <add>, %26, %cst_17 [0] : vector<32x48xf32> to vector<48xf32>
    %29 = vector.shape_cast %28 : vector<48xf32> to vector<1x48xf32>
    %30 = arith.addf %27, %29 : vector<1x48xf32>
    %c0_18 = arith.constant 0 : index
    %c0_19 = arith.constant 0 : index
    %31 = vector.load %arg9[%c0_18, %c0_19] : memref<1x48xf32, #tpu.memory_space<vmem>>, vector<1x48xf32>
    tpu.vector_store %arg9[%c0_18, %c0_19], %30 {strides = array<i32>} : memref<1x48xf32, #tpu.memory_space<vmem>>, vector<1x48xf32>,
    %c0_20 = arith.constant 0 : index
    %c0_21 = arith.constant 0 : index
    %32 = vector.load %arg10[%c0_20, %c0_21] : memref<1x1xf32, #tpu.memory_space<vmem>>, vector<1x1xf32>
    %cst_22 = arith.constant dense<0.000000e+00> : vector<1xf32>
    %33 = vector.multi_reduction <add>, %4, %cst_22 [0] : vector<32x1xf32> to vector<1xf32>
    %34 = vector.shape_cast %33 : vector<1xf32> to vector<1x1xf32>
    %35 = arith.addf %32, %34 : vector<1x1xf32>
    %c0_23 = arith.constant 0 : index
    %c0_24 = arith.constant 0 : index
    %36 = vector.load %arg10[%c0_23, %c0_24] : memref<1x1xf32, #tpu.memory_space<vmem>>, vector<1x1xf32>
    tpu.vector_store %arg10[%c0_23, %c0_24], %35 {strides = array<i32>} : memref<1x1xf32, #tpu.memory_space<vmem>>, vector<1x1xf32>,
    %c0_i32_25 = arith.constant 0 : i32
    %37 = arith.cmpi eq, %arg0, %c0_i32_25 : i32
    %38 = arith.extui %37 : i1 to i32
    %c0_i32_26 = arith.constant 0 : i32
    %39 = arith.cmpi ne, %38, %c0_i32_26 : i32
    scf.if %39 {
      %c0_27 = arith.constant 0 : index
      %c0_28 = arith.constant 0 : index
      %40 = vector.load %arg9[%c0_27, %c0_28] : memref<1x48xf32, #tpu.memory_space<vmem>>, vector<1x48xf32>
      %cst_29 = arith.constant dense<0.000000e+00> : vector<1xf32>
      %41 = vector.multi_reduction <add>, %40, %cst_29 [1] : vector<1x48xf32> to vector<1xf32>
      %42 = vector.shape_cast %41 : vector<1xf32> to vector<1x1xf32>
      %c0_30 = arith.constant 0 : index
      %c0_31 = arith.constant 0 : index
      %43 = vector.load %arg10[%c0_30, %c0_31] : memref<1x1xf32, #tpu.memory_space<vmem>>, vector<1x1xf32>
      %cst_32 = arith.constant 1.600000e+01 : f32
      %44 = vector.broadcast %cst_32 : f32 to vector<1x1xf32>
      %45 = arith.mulf %43, %44 : vector<1x1xf32>
      %cst_33 = arith.constant 9.99999974E-6 : f32
      %46 = vector.broadcast %cst_33 : f32 to vector<1x1xf32>
      %47 = arith.addf %45, %46 : vector<1x1xf32>
      %48 = arith.divf %42, %47 : vector<1x1xf32>
      %cst_34 = arith.constant 3.000000e+00 : f32
      %49 = vector.broadcast %cst_34 : f32 to vector<1x1xf32>
      %50 = arith.divf %48, %49 : vector<1x1xf32>
      %51 = vector.shape_cast %50 : vector<1x1xf32> to vector<1x1xf32>
      %52 = vector.broadcast %51 : vector<1x1xf32> to vector<1x128xf32>
      %c0_35 = arith.constant 0 : index
      %c0_36 = arith.constant 0 : index
      %53 = vector.load %arg8[%c0_35, %c0_36] : memref<1x128xf32, #tpu.memory_space<vmem>>, vector<1x128xf32>
      tpu.vector_store %arg8[%c0_35, %c0_36], %52 {strides = array<i32>} : memref<1x128xf32, #tpu.memory_space<vmem>>, vector<1x128xf32>,
    } else {
    }
    return
  }
  func.func @transform_0(%arg0: i32) -> (i32, i32) {
    %c0_i32 = arith.constant 0 : i32
    %c0_i32_0 = arith.constant 0 : i32
    return %arg0, %c0_i32 : i32, i32
  }
  func.func @transform_1(%arg0: i32) -> (i32, i32) {
    %c0_i32 = arith.constant 0 : i32
    %c0_i32_0 = arith.constant 0 : i32
    return %arg0, %c0_i32 : i32, i32
  }
  func.func @transform_2(%arg0: i32) -> (i32, i32) {
    %c0_i32 = arith.constant 0 : i32
    %c0_i32_0 = arith.constant 0 : i32
    %c0_i32_1 = arith.constant 0 : i32
    return %c0_i32, %c0_i32_0 : i32, i32
  }
  func.func @transform_3(%arg0: i32) -> (i32, i32) {
    %c0_i32 = arith.constant 0 : i32
    %c0_i32_0 = arith.constant 0 : i32
    %c0_i32_1 = arith.constant 0 : i32
    return %c0_i32, %c0_i32_0 : i32, i32
  }
  func.func @transform_4(%arg0: i32) -> (i32, i32) {
    %c0_i32 = arith.constant 0 : i32
    %c0_i32_0 = arith.constant 0 : i32
    %c0_i32_1 = arith.constant 0 : i32
    return %c0_i32, %c0_i32_0 : i32, i32
  }
  func.func @transform_5(%arg0: i32) -> (i32, i32) {
    %c0_i32 = arith.constant 0 : i32
    %c0_i32_0 = arith.constant 0 : i32
    %c0_i32_1 = arith.constant 0 : i32
    return %c0_i32, %c0_i32_0 : i32, i32
  }
  func.func @transform_6(%arg0: i32) -> (i32, i32) {
    %c0_i32 = arith.constant 0 : i32
    %c0_i32_0 = arith.constant 0 : i32
    %c0_i32_1 = arith.constant 0 : i32
    return %c0_i32, %c0_i32_0 : i32, i32
  }
  func.func @transform_7(%arg0: i32) -> (i32, i32) {
    %c0_i32 = arith.constant 0 : i32
    %c0_i32_0 = arith.constant 0 : i32
    %c0_i32_1 = arith.constant 0 : i32
    return %c0_i32, %c0_i32_0 : i32, i32
  }
}

</mosaic_0001>

<bundles_post_ra>
// kernel: simmim_forward.1
= control target key start
LH: loop header
LB: loop body
LE: loop exit
PB: predicated region body
PF: predicated region fallthrough
CT: control target
= control target key end

     0   :  { %v409_v2 = vmov 0   ;;  %vm283_vm0 = vcmask 7168   ;;  %vm77_vm1 = vcmask 392192   ;;  %s541_s0 = inlined_call_operand.vmem [shape: f32[32,48], index: 0, kind: input, shape index: {}]   ;;  %s542_s1 = inlined_call_operand.vmem [shape: f32[32,1], index: 1, kind: input, shape index: {}]   ;;  %s543_s2 = inlined_call_operand.vmem [shape: bf16[48,32], index: 2, kind: input, shape index: {}]   ;;  %s544_s3 = inlined_call_operand.vmem [shape: f32[1,32], index: 3, kind: input, shape index: {}]   ;;  %s545_s4 = inlined_call_operand.vmem [shape: f32[1,32], index: 4, kind: input, shape index: {}]   ;;  %s546_s5 = inlined_call_operand.vmem [shape: bf16[32,48], index: 5, kind: input, shape index: {}]   ;;  %s547_s6 = inlined_call_operand.vmem [shape: f32[1,48], index: 6, kind: input, shape index: {}]   ;;  %s548_s7 = inlined_call_operand.hbm [shape: f32[1,128], index: 7, kind: output, shape index: {}]  }
   0x1   :  { %v378_v0 = vld [vmem:[%s543_s2] sm:$0xff]   ;;  %v379_v1 = vld [vmem:[%s543_s2 + $0x8] sm:$0xff]   ;;  %376 = vset.pattern.permute.xlu0 %v409_v2  ;;  %377 = vset.pattern.permute.xlu1 %v409_v2  ;;  %v380_v5 = vld [vmem:[%s543_s2 + $0x10] sm:$0xff]  }
   0x2   :  { %355 = vmatprep.subr.bf16.mxu0 %v378_v0  ;;  %v461_v3 = vld [vmem:[%s541_s0] sm:$0xff]  ;;  %v466_v4 = vld [vmem:[%s541_s0 + $0x8] sm:$0xff]  ;;  %v42_v8 = vld [vmem:[%s542_s1 + $0x10] sm:$0xff] }
   0x3   :  { %356 = vmatpush3.bf16.msra.mxu0 %v378_v0  ;;  %v44_v6 = vpack.c.bf16 %v466_v4, %v461_v3  ;;  %v40_v7 = vld [vmem:[%s542_s1] sm:$0xff]  ;;  %v482_v9 = vld [vmem:[%s541_s0 + $0x10] sm:$0xff]  ;;  %156 = vperm.xlu1 %377, %v42_v8   ;;  %v287_v11 = vsel %vm283_vm0, %v42_v8, 0.0  ;;  %v41_v12 = vld [vmem:[%s542_s1 + $0x8] sm:$0xff] }
   0x4   :  { %357 = vmatprep.subr.bf16.mxu0 %v379_v1  ;;  %146 = vperm.xlu0 %376, %v40_v7   ;;  %v284_v10 = vsel %vm283_vm0, %v40_v7, 0.0  ;;  %v285_v13 = vsel %vm283_vm0, %v41_v12, 0.0  ;;  %v43_v14 = vld [vmem:[%s542_s1 + $0x18] sm:$0xff] }
   0x5   :  { %361 = vmatprep.mubr.msk.bf16.mxu0 %vm77_vm1, %v44_v6  ;;  %v497_v15 = vld [vmem:[%s541_s0 + $0x18] sm:$0xff]  ;;  %v286_v16 = vadd.f32 %v285_v13, %v284_v10 }
   0x7   :  { %358 = vmatpush3.bf16.msra.mxu0 %v379_v1 }
   0x8   :  { %12 = vsyncpa [#allocation5], 0  ;;  %359 = vmatprep.subr.bf16.mxu0 %v380_v5  ;;  %v289_v17 = vsel %vm283_vm0, %v43_v14, 0.0  ;;  %151 = vperm.xlu0 %376, %v41_v12   ;;  %v288_v18 = vadd.f32 %v287_v11, %v286_v16  ;;  %v45_v19 = vpack.c.bf16 %v497_v15, %v482_v9  ;;  %v381_v21 = vld [vmem:[%s546_s5] sm:$0xff]   ;;  %v382_v22 = vld [vmem:[%s546_s5 + $0x8] sm:$0xff]   ;;  %vm197_vm2 = vcmask 261120  }
   0x9   :  { %161 = vperm.xlu1 %377, %v43_v14   ;;  %365 = vmatprep.subr.bf16.mxu1 %v381_v21  ;;  %v334_v23 = vld [vmem:[%s544_s3] ss:$0 sm:$0xff]  ;;  %vm32_vm3 = vcmask 385024   ;;  %v410_v55 = vmov 0.0   ;;  %vm34_vm4 = vcmask 0   ;;  %s411_s5 = smov [#allocation4]  }
   0xa   :  { %v290_v20 = vadd.f32 %v289_v17, %v288_v18  ;;  %366 = vmatpush3.bf16.msra.mxu1 %v381_v21  ;;  %v340_v26 = vld [vmem:[%s545_s4] ss:$0 sm:$0xff]  ;;  %33 = vst.msk [vmem:[#allocation2] sm:$0x1] %vm32_vm3, %v410_v55 }
   0xb   :  { %360 = vmatpush3.bf16.msra.mxu0 %v380_v5  ;;  %367 = vmatprep.subr.bf16.mxu1 %v382_v22  ;;  %35 = vst.msk [vmem:[#allocation3] sm:$0x1] %vm34_vm4, %v410_v55  ;;  %v341_v60 = vld [vmem:[%s547_s6] ss:$0 sm:$0xff]  ;;  %s326_s6 = sshll.u32 %s411_s5, 4  ;;  %s327_s6 = int_to_ptr.vmem [resolvable:$true] %s326_s6 }
   0xc   :  { %v291_v51 = vrot.slane %v290_v20, 4  ;;  %s385_s28 = scalar_lea.vmem %s327_s6, 16  ;;  %s389_s29 = scalar_lea.vmem %s327_s6, 32 }
   0xd   :  { %p386_p0 = scmp.ne.s32.totalorder %s327_s6, %s385_s28  ;;  %p390_p1 = scmp.lt.s32.totalorder %s327_s6, %s327_s6 }
   0xe   :  { %362 = vmatmul.mubr.msk.bf16.vlgmr.msra.gmra.mrb[0].mxu0 %vm77_vm1, %v45_v19  ;;  %368 = vmatpush3.bf16.msra.mxu1 %v382_v22  ;;  %v292_v52 = vadd.f32 %v291_v51, %v290_v20  ;;  %p391_p2 = scmp.lt.s32.totalorder %s389_s29, %s385_s28 }
  0x10   :  { %v293_v53 = vrot.slane %v292_v52, 2  ;;  %p392_p3 = por %p391_p2, %p390_p1 }
  0x12   :  { %v294_v54 = vadd.f32 %v293_v53, %v292_v52  ;;  %v282_v58 = vld [vmem:[#allocation3] sm:$0x1]  ;;  %p393_p4 = pnand %p392_p3, %p386_p0 }
  0x14   :  { %v295_v56 = vrot.slane %v294_v54, 1 }
  0x16   :  { %v296_v57 = vadd.f32 %v295_v56, %v294_v54 }
  0x18   :  { %v297_v59 = vadd.f32 %v296_v57, %v282_v58 }
  0x1a   :  { %299 = vst.msk [vmem:[#allocation3] sm:$0x1] %vm34_vm4, %v297_v59 }
  0x82   :  { %v157_v24 = vpop.permute.xlu1 %156 }
  0x83   :  { %v147_v27 = vpop.permute.xlu0 %146 }
  0x87   :  { %v152_v42 = vpop.permute.xlu0 %151 }
  0x88   :  { %v162_v41 = vpop.permute.xlu1 %161 }
  0xe1   :  { %v363_v25 = vpop.f32.mrb[0].mxu0 }
  0xe2   :  { %v127_v28 = vadd.f32 %v363_v25, %v334_v23  ;;  %v118_v29 = vpop.f32.mrb[1].mxu0 }
  0xe3   :  { %v119_v30 = vadd.f32 %v334_v23, %v118_v29  ;;  %v364_v31 = vpop.f32.mrb[2].mxu0 }
  0xe4   :  { %v142_v32 = vsub.f32 %v340_v26, %v127_v28  ;;  %v130_v33 = vadd.f32 %v364_v31, %v334_v23  ;;  %v121_v34 = vpop.f32.mrb[3].mxu0 }
  0xe5   :  { %v140_v35 = vsub.f32 %v340_v26, %v119_v30  ;;  %v122_v36 = vadd.f32 %v334_v23, %v121_v34  ;;  %v307_v34 = vld [vmem:[#allocation3] sm:$0x1] }
  0xe6   :  { %v166_v37 = vmul.f32 %v157_v24, %v142_v32  ;;  %v143_v38 = vsub.f32 %v340_v26, %v130_v33 }
  0xe7   :  { %v164_v39 = vmul.f32 %v147_v27, %v140_v35  ;;  %v141_v40 = vsub.f32 %v340_v26, %v122_v36  ;;  %v308_v35 = vmul.f32 16.0, %v307_v34 }
  0xe8   :  { %v167_v43 = vmul.f32 %v162_v41, %v143_v38  ;;  %v170_v45 = vadd.f32 %v166_v37, %v127_v28 }
  0xe9   :  { %v165_v44 = vmul.f32 %v152_v42, %v141_v40  ;;  %v168_v47 = vadd.f32 %v164_v39, %v119_v30  ;;  %v265_v30 = vld [vmem:[#allocation2] sm:$0x1] }
  0xea   :  { %v171_v46 = vadd.f32 %v167_v43, %v130_v33 }
  0xeb   :  { %v169_v48 = vadd.f32 %v165_v44, %v122_v36  ;;  %v309_v36 = vadd.f32 1e-05, %v308_v35 }
  0xec   :  { %v173_v49 = vpack.c.bf16 %v171_v46, %v170_v45 }
  0xed   :  { %v172_v50 = vpack.c.bf16 %v169_v48, %v168_v47  ;;  %383 = vrcp.f32 %v309_v36 }
  0xef   :  { %369 = vmatprep.mubr.msk.bf16.mxu1 %vm197_vm2, %v172_v50 }
  0xf0   :  { %370 = vmatmul.mubr.msk.bf16.vlgmr.msra.gmra.mrb[0].mxu1 %vm197_vm2, %v173_v49 }
  0xf7   :  { %v384_v37 = vpop.eup %383 }
 0x1c3   :  { %v371_v61 = vpop.f32.mrb[0].mxu1 }
 0x1c4   :  { %v247_v62 = vadd.f32 %v371_v61, %v341_v60  ;;  %v238_v63 = vpop.f32.mrb[1].mxu1 }
 0x1c5   :  { %v239_v0 = vadd.f32 %v341_v60, %v238_v63  ;;  %v372_v1 = vpop.f32.mrb[2].mxu1 }
 0x1c6   :  { %v255_v2 = vsub.f32 %v482_v9, %v247_v62  ;;  %v250_v5 = vadd.f32 %v372_v1, %v341_v60  ;;  %v241_v6 = vpop.f32.mrb[3].mxu1 }
 0x1c7   :  { %v253_v7 = vsub.f32 %v461_v3, %v239_v0  ;;  %v242_v8 = vadd.f32 %v341_v60, %v241_v6 }
 0x1c8   :  { %v256_v10 = vsub.f32 %v497_v15, %v250_v5  ;;  %v259_v11 = vand.u32 2147483647, %v255_v2 }
 0x1c9   :  { %v257_v12 = vand.u32 2147483647, %v253_v7  ;;  %v254_v13 = vsub.f32 %v466_v4, %v242_v8 }
 0x1ca   :  { %v260_v16 = vand.u32 2147483647, %v256_v10  ;;  %v263_v18 = vmul.f32 %v259_v11, %v157_v24 }
 0x1cb   :  { %v261_v14 = vmul.f32 %v257_v12, %v147_v27  ;;  %v258_v17 = vand.u32 2147483647, %v254_v13 }
 0x1cc   :  { %v264_v21 = vmul.f32 %v260_v16, %v162_v41  ;;  %v269_v3 = vsel %vm77_vm1, %v263_v18, 0.0 }
 0x1cd   :  { %v262_v19 = vmul.f32 %v258_v17, %v152_v42  ;;  %v266_v20 = vsel %vm77_vm1, %v261_v14, 0.0 }
 0x1ce   :  { %v271_v15 = vsel %vm77_vm1, %v264_v21, 0.0 }
 0x1cf   :  { %v267_v9 = vsel %vm77_vm1, %v262_v19, 0.0 }
 0x1d0   :  { %v268_v22 = vadd.f32 %v267_v9, %v266_v20 }
 0x1d2   :  { %v270_v23 = vadd.f32 %v269_v3, %v268_v22 }
 0x1d4   :  { %v272_v25 = vadd.f32 %v271_v15, %v270_v23 }
 0x1d6   :  { %v273_v26 = vrot.slane %v272_v25, 4 }
 0x1d8   :  { %v274_v28 = vadd.f32 %v273_v26, %v272_v25 }
 0x1da   :  { %v275_v4 = vrot.slane %v274_v28, 2 }
 0x1dc   :  { %v276_v27 = vadd.f32 %v275_v4, %v274_v28 }
 0x1de   :  { %v277_v29 = vrot.slane %v276_v27, 1 }
 0x1e0   :  { %v278_v24 = vadd.f32 %v277_v29, %v276_v27 }
 0x1e2   :  { %v279_v31 = vadd.f32 %v278_v24, %v265_v30 }
 0x1e4   :  { %281 = vst.msk [vmem:[#allocation2] sm:$0x1] %vm32_vm3, %v279_v31 }
 0x1eb   :  { %v303_v32 = vld [vmem:[#allocation2] sm:$0x1] }
 0x1ec   :  { %v304_v33 = vsel %vm32_vm3, %v303_v32, 0.0 }
 0x1ed   :  { %305 = vadd.xlane.f32.xlu0 %v304_v33 }
 0x27a   :  { %v306_v38 = vpop.xlane.xlu0 %305 }
 0x27b   :  { %v311_v39 = vmul.f32 %v384_v37, %v306_v38 }
 0x27d   :  { %v313_v40 = vmul.f32 0.33333334, %v311_v39 }
 0x27f   :  { %316 = vperm.xlu1 %377, %v313_v40  }
 0x2fe   :  { %v317_v41 = vpop.permute.xlu1 %316 }
 0x2ff   :  { %319 = vst [vmem:[#allocation4] sm:$0x1] %v317_v41 }
 0x300   :  { %396 = shalt.err (!%p393_p4)
}
 0x301   :  { %s397_s9 = scalar_lea.hbm %s548_s7, 16 }
 0x302   :  { %p398_p5 = scmp.ne.s32.totalorder %s548_s7, %s397_s9  ;;  %p401_p6 = scmp.lt.u32.totalorder %s397_s9, %s548_s7 }
 0x304   :  { %p403_p7 = pnand %p401_p6, %p398_p5 }
 0x306   :  { %406 = shalt.err (!%p403_p7)
}
 0x307   :  { %329 = dma.vmem_to_hbm [thread:$0]  %s327_s6, 16, %s548_s7, [#allocation5]  }
 0x308   :  { %407 = dma.done.wait [#allocation5], 16  }
 0x309   :  { %408 = vsyncadd [#allocation5], 4294967280 }
 0x30a   :  { %333 = vsyncpa [#allocation5], 1 }

</bundles_post_ra>
